<compile_context>
chip_gen: v5e
topology: v5e:2x2
jax: 0.10.0
libtpu: 0.0.40
codegen_flags: <defaults>
</compile_context>

<pallas_src>
import jax
import jax.numpy as jnp
from jax.experimental import pallas as pl
from jax.experimental.pallas import tpu as pltpu

_LANES = 128
_SUBLANES = 8


def _smooth_l1(p, t):
    """Elementwise Smooth-L1 (beta=1.0, PyTorch default), computed in f32."""
    d = p.astype(jnp.float32) - t.astype(jnp.float32)
    a = jnp.abs(d)
    return jnp.where(a < 1.0, 0.5 * d * d, a - 0.5)


def _round_up(x, a):
    return ((x + a - 1) // a) * a


def _make_kernel(row_tile: int, blocks_per_chunk: int, m_rows: int,
                 needs_ragged: bool):
    def kernel(pred_ref, tgt_ref, out_ref):
        c = pl.program_id(0)   # chunk axis ("parallel": megacore split on v7x)
        i = pl.program_id(1)   # reduction axis ("arbitrary")

        @pl.when(i == 0)
        def _init():
            out_ref[...] = jnp.zeros_like(out_ref)

        # Cast on load (VPU); HBM traffic stays at native dtype width.
        diff = pred_ref[...].astype(jnp.float32) - tgt_ref[...].astype(jnp.float32)
        absd = jnp.abs(diff)
        # Smooth L1, beta = 1.0: 0.5*x^2 if |x|<1 else |x|-0.5
        loss = jnp.where(absd < 1.0, 0.5 * diff * diff, absd - 0.5)

        def _accum(x):
            # Fold (row_tile,128) -> (8,128): pure per-lane VPU adds across the
            # (8,128) tiles; keeps the live accumulator at a single vreg column
            # (the resident output block) instead of a full-tile scratch.
            out_ref[0] += x.reshape(-1, _SUBLANES, _LANES).sum(axis=0)

        if not needs_ragged:
            _accum(loss)
        else:
            g = c * blocks_per_chunk + i            # global (unclamped) block idx
            is_full = (g + 1) * row_tile <= m_rows

            @pl.when(is_full)
            def _full():
                _accum(loss)

            @pl.when(jnp.logical_not(is_full))
            def _ragged():
                rows = jax.lax.broadcasted_iota(jnp.int32, (row_tile, _LANES), 0)
                valid = (g * row_tile + rows) < m_rows
                # True select (NOT multiplicative masking): garbage/NaN rows from
                # uninitialized VMEM must be dropped, not multiplied by zero.
                _accum(jnp.where(valid, loss, 0.0))

    return kernel


def smooth_l1_sum_over_queries(pred, tgt, num_queries: int, *,
                               row_tile: int = 2048,
                               min_kernel_elems: int = 1 << 16):
    """smooth_l1(pred, tgt).sum() / num_queries via a Pallas TPU kernel."""
    assert pred.shape == tgt.shape, (pred.shape, tgt.shape)

    flat_p = pred.reshape(-1)   # bitcast for dense row-major inputs (no copy)
    flat_t = tgt.reshape(-1)
    n_elems = flat_p.shape[0]
    m_rows = n_elems // _LANES
    tail = n_elems - m_rows * _LANES

    # Small-input bypass: real POTR shapes are a handful of vregs; the kernel
    # launch + DMA setup would dominate. Plain XLA fusion is essentially free.
    if n_elems < min_kernel_elems or m_rows == 0:
        return jnp.sum(_smooth_l1(flat_p, flat_t)) / num_queries

    # Lane-dense [m_rows, 128] view of the aligned prefix. No jnp.pad of the
    # full array; the <=127 tail elements go through a tiny JAX epilogue.
    if tail:
        # TODO(synk): XLA may still materialize the prefix slice as a copy; a
        # fully copy-free ragged path needs memory_space=pl.ANY + manual DMA.
        body_p = flat_p[: m_rows * _LANES]
        body_t = flat_t[: m_rows * _LANES]
    else:
        body_p, body_t = flat_p, flat_t
    p2 = body_p.reshape(m_rows, _LANES)
    t2 = body_t.reshape(m_rows, _LANES)

    # Row tile: as large as possible (amortize ~0.35us/grid-step), aligned to
    # the dtype's sublane packing (8 rows f32, 16 bf16, 32 int8/fp8).
    min_itemsize = min(pred.dtype.itemsize, tgt.dtype.itemsize)
    align = _SUBLANES * max(1, 4 // int(min_itemsize))
    row_tile = max(align, min(int(row_tile), _round_up(m_rows, align)))
    row_tile = _round_up(row_tile, align)

    num_blocks = pl.cdiv(m_rows, row_tile)
    num_chunks = 2 if num_blocks >= 2 else 1   # megacore split (v7x has 2 TCs)
    bpc = pl.cdiv(num_blocks, num_chunks)
    grid = (num_chunks, bpc)
    # Any block whose row range reaches past m_rows (ragged last block or a
    # clamped duplicate block) must be masked; decided statically here.
    needs_ragged = (num_chunks * bpc * row_tile) > m_rows

    def in_map(c, i):
        # Clamp so the (possibly) extra trailing block of the last chunk never
        # indexes out of bounds; its rows are fully masked in-kernel.
        return (jnp.minimum(c * bpc + i, num_blocks - 1), 0)

    kernel = _make_kernel(row_tile, bpc, m_rows, needs_ragged)

    partials = pl.pallas_call(
        kernel,
        out_shape=jax.ShapeDtypeStruct((num_chunks, _SUBLANES, _LANES),
                                       jnp.float32),
        grid_spec=pltpu.PrefetchScalarGridSpec(
            num_scalar_prefetch=0,
            grid=grid,
            in_specs=[
                pl.BlockSpec((row_tile, _LANES), in_map),
                pl.BlockSpec((row_tile, _LANES), in_map),
            ],
            # Per-chunk (8,128) accumulator lives in the resident output block.
            out_specs=pl.BlockSpec((1, _SUBLANES, _LANES),
                                   lambda c, i: (c, 0, 0)),
        ),
        compiler_params=pltpu.CompilerParams(
            dimension_semantics=("parallel", "arbitrary"),
            vmem_limit_bytes=32 * 1024 * 1024,
        ),
    )(p2, t2)

    total = jnp.sum(partials)                       # tiny (2,8,128) reduce
    if tail:
        total = total + jnp.sum(_smooth_l1(flat_p[m_rows * _LANES:],
                                           flat_t[m_rows * _LANES:]))
    return total / num_queries


class SetCriterion:
    """JAX/Pallas re-implementation of the POTR SetCriterion forward pass."""

    def __init__(self, num_queries, weight_dict, losses):
        self.num_queries = num_queries
        self.weight_dict = weight_dict
        self.losses = losses

    def loss_coords(self, outputs, targets, **kwargs):
        # Accept a pre-stacked [B, Q, D] array (no extra HBM copy) or a list of
        # per-sample [Q, D] arrays (stacked once here, matching torch.stack).
        tgt = jnp.stack(targets) if isinstance(targets, (list, tuple)) else targets
        val = smooth_l1_sum_over_queries(outputs, tgt, self.num_queries, **kwargs)
        return {"loss_coords": val}

    def get_loss(self, loss, outputs, targets, **kwargs):
        loss_map = {"coords": self.loss_coords}
        return loss_map[loss](outputs, targets, **kwargs)

    def forward(self, outputs, targets, **kwargs):
        losses = {}
        for loss in self.losses:
            losses.update(self.get_loss(loss, outputs, targets, **kwargs))
        return losses

    __call__ = forward


def _ref_loss(outputs, targets_stacked, num_queries):
    return jnp.sum(_smooth_l1(outputs, targets_stacked)) / num_queries


if __name__ == "__main__":
    key = jax.random.PRNGKey(0)
    k = jax.random.split(key, 8)

    # 1) POTR-scale demo (B=2, Q=8 landmarks, D=2 coords) -> small-input bypass.
    B, Q, D = 2, 8, 2
    out1 = jax.random.uniform(k[0], (B, Q, D), dtype=jnp.float32)
    tgt1 = [jax.random.uniform(jax.random.fold_in(k[1], i), (Q, D),
                               dtype=jnp.float32) for i in range(B)]
    crit = SetCriterion(num_queries=Q, weight_dict={"loss_coords": 1.0},
                        losses=["coords"])
    v1 = jax.block_until_ready(crit(out1, tgt1)["loss_coords"])
    r1 = _ref_loss(out1, jnp.stack(tgt1), Q)
    assert jnp.allclose(v1, r1, atol=1e-5, rtol=1e-5), (v1, r1)

    # 2) lane-unaligned, forced through the kernel: single ragged block + tail
    #    epilogue (grid (1,1)).
    B, Q, D = 4, 98, 2
    out2 = 3.0 * jax.random.uniform(k[2], (B, Q, D), dtype=jnp.float32) - 1.5
    tgt2 = 3.0 * jax.random.uniform(k[3], (B, Q, D), dtype=jnp.float32) - 1.5
    v2 = jax.block_until_ready(
        smooth_l1_sum_over_queries(out2, tgt2, Q, min_kernel_elems=0))
    r2 = _ref_loss(out2, tgt2, Q)
    assert jnp.allclose(v2, r2, atol=1e-4, rtol=1e-5), (v2, r2)

    # 3) multi-block kernel path: 2 chunks x 3 steps, clamped trailing block,
    #    ragged last real block, lane tail epilogue (grid (2,3), row_tile=8).
    B, Q, D = 2, 1200, 2
    out3 = 4.0 * jax.random.uniform(k[4], (B, Q, D), dtype=jnp.float32) - 2.0
    tgt3 = 4.0 * jax.random.uniform(k[5], (B, Q, D), dtype=jnp.float32) - 2.0
    v3 = jax.block_until_ready(
        smooth_l1_sum_over_queries(out3, tgt3, Q, row_tile=8, min_kernel_elems=0))
    r3 = _ref_loss(out3, tgt3, Q)
    assert jnp.allclose(v3, r3, atol=1e-3, rtol=1e-5), (v3, r3)

    # 4) bf16 inputs: 16-row sublane alignment, multi-(8,128)-tile accumulation,
    #    cast-on-load (grid (2,1), row_tile=16).
    B, Q, D = 2, 768, 2
    out4 = (2.0 * jax.random.uniform(k[6], (B, Q, D), dtype=jnp.float32)
            - 1.0).astype(jnp.bfloat16)
    tgt4 = (2.0 * jax.random.uniform(k[7], (B, Q, D), dtype=jnp.float32)
            - 1.0).astype(jnp.bfloat16)
    v4 = jax.block_until_ready(
        smooth_l1_sum_over_queries(out4, tgt4, Q, row_tile=16, min_kernel_elems=0))
    r4 = _ref_loss(out4, tgt4, Q)
    assert jnp.allclose(v4, r4, atol=1e-3, rtol=1e-4), (v4, r4)

    print("KERNEL_OK")
</pallas_src>

<mosaic_0001>
module attributes {stable_mosaic.version = 11 : i64} {
  func.func @kernel(%arg0: i32, %arg1: i32, %arg2: memref<8x128xf32, #tpu.memory_space<vmem>>, %arg3: memref<8x128xf32, #tpu.memory_space<vmem>>, %arg4: memref<1x8x128xf32, #tpu.memory_space<vmem>>) attributes {dimension_semantics = [#tpu.dimension_semantics<parallel>, #tpu.dimension_semantics<arbitrary>], iteration_bounds = array<i64: 1, 1>, scalar_prefetch = 0 : i64, scratch_operands = 0 : i64, tpu.core_type = #tpu.core_type<tc>, window_params = [{transform_indices = @transform_0, window_bounds = array<i64: 8, 128>}, {transform_indices = @transform_1, window_bounds = array<i64: 8, 128>}, {transform_indices = @transform_2, window_bounds = array<i64: 1, 8, 128>}]} {
    %c0_i32 = arith.constant 0 : i32
    %0 = arith.cmpi eq, %arg1, %c0_i32 : i32
    %1 = arith.extui %0 : i1 to i32
    %c0_i32_0 = arith.constant 0 : i32
    %2 = arith.cmpi ne, %1, %c0_i32_0 : i32
    scf.if %2 {
      %cst_9 = arith.constant 0.000000e+00 : f32
      %25 = vector.broadcast %cst_9 : f32 to vector<1x8x128xf32>
      %c0_10 = arith.constant 0 : index
      %c0_11 = arith.constant 0 : index
      %c0_12 = arith.constant 0 : index
      %26 = vector.load %arg4[%c0_10, %c0_11, %c0_12] : memref<1x8x128xf32, #tpu.memory_space<vmem>>, vector<1x8x128xf32>
      tpu.vector_store %arg4[%c0_10, %c0_11, %c0_12], %25 {strides = array<i32>} : memref<1x8x128xf32, #tpu.memory_space<vmem>>, vector<1x8x128xf32>,
    } else {
    }
    %c0 = arith.constant 0 : index
    %c0_1 = arith.constant 0 : index
    %3 = vector.load %arg2[%c0, %c0_1] : memref<8x128xf32, #tpu.memory_space<vmem>>, vector<8x128xf32>
    %c0_2 = arith.constant 0 : index
    %c0_3 = arith.constant 0 : index
    %4 = vector.load %arg3[%c0_2, %c0_3] : memref<8x128xf32, #tpu.memory_space<vmem>>, vector<8x128xf32>
    %5 = arith.subf %3, %4 : vector<8x128xf32>
    %6 = math.absf %5 : vector<8x128xf32>
    %cst = arith.constant 1.000000e+00 : f32
    %7 = vector.broadcast %cst : f32 to vector<8x128xf32>
    %8 = arith.cmpf olt, %6, %7 : vector<8x128xf32>
    %cst_4 = arith.constant 5.000000e-01 : f32
    %9 = vector.broadcast %cst_4 : f32 to vector<8x128xf32>
    %10 = arith.mulf %9, %5 : vector<8x128xf32>
    %11 = arith.mulf %10, %5 : vector<8x128xf32>
    %cst_5 = arith.constant 5.000000e-01 : f32
    %12 = vector.broadcast %cst_5 : f32 to vector<8x128xf32>
    %13 = arith.subf %6, %12 : vector<8x128xf32>
    %14 = arith.select %8, %11, %13 : vector<8x128xi1>, vector<8x128xf32>
    %c1_i32 = arith.constant 1 : i32
    %15 = arith.muli %arg0, %c1_i32 : i32
    %16 = arith.addi %15, %arg1 : i32
    %c1_i32_6 = arith.constant 1 : i32
    %17 = arith.addi %16, %c1_i32_6 : i32
    %c8_i32 = arith.constant 8 : i32
    %18 = arith.muli %17, %c8_i32 : i32
    %c6_i32 = arith.constant 6 : i32
    %19 = arith.cmpi sle, %18, %c6_i32 : i32
    %20 = arith.extui %19 : i1 to i32
    %c0_i32_7 = arith.constant 0 : i32
    %21 = arith.cmpi ne, %20, %c0_i32_7 : i32
    scf.if %21 {
      %c0_9 = arith.constant 0 : index
      %c0_10 = arith.constant 0 : index
      %c0_11 = arith.constant 0 : index
      %25 = vector.load %arg4[%c0_9, %c0_10, %c0_11] : memref<1x8x128xf32, #tpu.memory_space<vmem>>, vector<1x8x128xf32>
      %26 = vector.shape_cast %25 : vector<1x8x128xf32> to vector<8x128xf32>
      %27 = vector.shape_cast %14 : vector<8x128xf32> to vector<1x8x128xf32>
      %cst_12 = arith.constant dense<0.000000e+00> : vector<8x128xf32>
      %28 = vector.multi_reduction <add>, %27, %cst_12 [0] : vector<1x8x128xf32> to vector<8x128xf32>
      %29 = arith.addf %26, %28 : vector<8x128xf32>
      %c0_13 = arith.constant 0 : index
      %c0_14 = arith.constant 0 : index
      %c0_15 = arith.constant 0 : index
      %30 = vector.load %arg4[%c0_13, %c0_14, %c0_15] : memref<1x8x128xf32, #tpu.memory_space<vmem>>, vector<1x8x128xf32>
      %31 = vector.shape_cast %30 : vector<1x8x128xf32> to vector<8x128xf32>
      %32 = vector.shape_cast %29 : vector<8x128xf32> to vector<1x8x128xf32>
      tpu.vector_store %arg4[%c0_13, %c0_14, %c0_15], %32 {strides = array<i32>} : memref<1x8x128xf32, #tpu.memory_space<vmem>>, vector<1x8x128xf32>,
    } else {
    }
    %true = arith.constant true
    %22 = arith.xori %19, %true : i1
    %23 = arith.extui %22 : i1 to i32
    %c0_i32_8 = arith.constant 0 : i32
    %24 = arith.cmpi ne, %23, %c0_i32_8 : i32
    scf.if %24 {
      %25 = tpu.iota {dimensions = array<i32: 0>} : vector<8x128xi32>
      %c8_i32_9 = arith.constant 8 : i32
      %26 = arith.muli %16, %c8_i32_9 : i32
      %27 = vector.broadcast %26 : i32 to vector<8x128xi32>
      %28 = arith.addi %27, %25 : vector<8x128xi32>
      %c6_i32_10 = arith.constant 6 : i32
      %29 = vector.broadcast %c6_i32_10 : i32 to vector<8x128xi32>
      %30 = arith.cmpi slt, %28, %29 : vector<8x128xi32>
      %cst_11 = arith.constant 0.000000e+00 : f32
      %31 = vector.broadcast %cst_11 : f32 to vector<8x128xf32>
      %32 = arith.select %30, %14, %31 : vector<8x128xi1>, vector<8x128xf32>
      %c0_12 = arith.constant 0 : index
      %c0_13 = arith.constant 0 : index
      %c0_14 = arith.constant 0 : index
      %33 = vector.load %arg4[%c0_12, %c0_13, %c0_14] : memref<1x8x128xf32, #tpu.memory_space<vmem>>, vector<1x8x128xf32>
      %34 = vector.shape_cast %33 : vector<1x8x128xf32> to vector<8x128xf32>
      %35 = vector.shape_cast %32 : vector<8x128xf32> to vector<1x8x128xf32>
      %cst_15 = arith.constant dense<0.000000e+00> : vector<8x128xf32>
      %36 = vector.multi_reduction <add>, %35, %cst_15 [0] : vector<1x8x128xf32> to vector<8x128xf32>
      %37 = arith.addf %34, %36 : vector<8x128xf32>
      %c0_16 = arith.constant 0 : index
      %c0_17 = arith.constant 0 : index
      %c0_18 = arith.constant 0 : index
      %38 = vector.load %arg4[%c0_16, %c0_17, %c0_18] : memref<1x8x128xf32, #tpu.memory_space<vmem>>, vector<1x8x128xf32>
      %39 = vector.shape_cast %38 : vector<1x8x128xf32> to vector<8x128xf32>
      %40 = vector.shape_cast %37 : vector<8x128xf32> to vector<1x8x128xf32>
      tpu.vector_store %arg4[%c0_16, %c0_17, %c0_18], %40 {strides = array<i32>} : memref<1x8x128xf32, #tpu.memory_space<vmem>>, vector<1x8x128xf32>,
    } else {
    }
    return
  }
  func.func @transform_0(%arg0: i32, %arg1: i32) -> (i32, i32) {
    %c1_i32 = arith.constant 1 : i32
    %0 = arith.muli %arg0, %c1_i32 : i32
    %1 = arith.addi %0, %arg1 : i32
    %c0_i32 = arith.constant 0 : i32
    %2 = arith.minsi %1, %c0_i32 : i32
    %c0_i32_0 = arith.constant 0 : i32
    %c0_i32_1 = arith.constant 0 : i32
    return %2, %c0_i32_0 : i32, i32
  }
  func.func @transform_1(%arg0: i32, %arg1: i32) -> (i32, i32) {
    %c1_i32 = arith.constant 1 : i32
    %0 = arith.muli %arg0, %c1_i32 : i32
    %1 = arith.addi %0, %arg1 : i32
    %c0_i32 = arith.constant 0 : i32
    %2 = arith.minsi %1, %c0_i32 : i32
    %c0_i32_0 = arith.constant 0 : i32
    %c0_i32_1 = arith.constant 0 : i32
    return %2, %c0_i32_0 : i32, i32
  }
  func.func @transform_2(%arg0: i32, %arg1: i32) -> (i32, i32, i32) {
    %c0_i32 = arith.constant 0 : i32
    %c0_i32_0 = arith.constant 0 : i32
    %c0_i32_1 = arith.constant 0 : i32
    return %arg0, %c0_i32, %c0_i32_0 : i32, i32, i32
  }
}

</mosaic_0001>

<bundles_post_ra>
// kernel: tpu_custom_call.1
= control target key start
LH: loop header
LB: loop body
LE: loop exit
PB: predicated region body
PF: predicated region fallthrough
CT: control target
= control target key end

     0   :  { %7 = vsyncpa [#allocation3], 0  ;;  %s228_s0 = inlined_call_operand.hbm [shape: f32[6,128], index: 0, kind: input, shape index: {}]   ;;  %s229_s1 = inlined_call_operand.hbm [shape: f32[6,128], index: 1, kind: input, shape index: {}]   ;;  %s230_s2 = inlined_call_operand.hbm [shape: f32[1,8,128], index: 2, kind: output, shape index: {}]  }
   0x1   :  { %8 = vsyncpa [#allocation6], 0 }
   0x2   :  { %9 = vsyncpa [#allocation4], 0  ;;  %s20_s11 = sshll.u32 %s228_s0, 4  ;;  %s201_s12 = smov [#allocation2]   ;;  %s21_s11 = int_to_ptr.hbm [resolvable:$true] %s20_s11 }
   0x3   :  { %s22_s13 = sshll.u32 %s201_s12, 4  ;;  %s36_s16 = sshll.u32 %s229_s1, 4  ;;  %s23_s13 = int_to_ptr.vmem [resolvable:$true] %s22_s13  ;;  %s37_s16 = int_to_ptr.hbm [resolvable:$true] %s36_s16 }
   0x4   :  { %25 = dma.hbm_to_vmem [thread:$0]  %s21_s11, 128, %s23_s13, [#allocation3]  }
   0x5   :  { %s202_s17 = smov [#allocation5]  }
   0x6   :  { %s38_s18 = sshll.u32 %s202_s17, 4  ;;  %s39_s18 = int_to_ptr.vmem [resolvable:$true] %s38_s18 }
   0x7   :  { %41 = dma.hbm_to_vmem [thread:$0]  %s37_s16, 128, %s39_s18, [#allocation6]  }
   0x8   :  { %195 = dma.done.wait [#allocation3], 128  }
   0x9   :  { %196 = vsyncadd [#allocation3], 4294967168 }
   0xa   :  { %197 = dma.done.wait [#allocation6], 128  }
   0xb   :  { %198 = vsyncadd [#allocation6], 4294967168  ;;  %v85_v0 = vlaneseq  ;;  %v61_v1 = vld [vmem:[#allocation2] sm:$0xff]  ;;  %v62_v2 = vld [vmem:[#allocation5] sm:$0xff]  ;;  %s203_s0 = smov [#allocation7]   ;;  %s103_s21 = sshll.u32 %s230_s2, 4  ;;  %s104_s21 = int_to_ptr.hbm [resolvable:$true] %s103_s21 }
   0xc   :  { %v63_v3 = vsub.f32 %v61_v1, %v62_v2  ;;  %s101_s1 = sshll.u32 %s203_s0, 4  ;;  %s102_s1 = int_to_ptr.vmem [resolvable:$true] %s101_s1 }
   0xd   :  { %v86_v4 = vshrl.u32 %v85_v0, 7 }
   0xe   :  { %v64_v5 = vand.u32 2147483647, %v63_v3  ;;  %v66_v6 = vmul.f32 0.5, %v63_v3 }
   0xf   :  { %vm90_vm1 = vcmp.lt.s32.totalorder %v86_v4, 6 }
  0x10   :  { %vm65_vm0 = vcmp.lt.f32.partialorder %v64_v5, 1.0  ;;  %v67_v7 = vmul.f32 %v66_v6, %v63_v3  ;;  %v118_v8 = vadd.f32 -0.5, %v64_v5 }
  0x12   :  { %v69_v9 = vsel %vm65_vm0, %v67_v7, %v118_v8 }
  0x13   :  { %v91_v10 = vsel %vm90_vm1, %v69_v9, 0.0 }
  0x14   :  { %95 = vst [vmem:[#allocation7] sm:$0xff] %v91_v10 }
  0x15   :  { %106 = dma.vmem_to_hbm [thread:$0]  %s102_s1, 128, %s104_s21, [#allocation4]  }
  0x16   :  { %199 = dma.done.wait [#allocation4], 128  }
  0x17   :  { %200 = vsyncadd [#allocation4], 4294967168 }
  0x18   :  { %111 = vsyncpa [#allocation3], 1 }
  0x19   :  { %112 = vsyncpa [#allocation6], 1 }
  0x1a   :  { %113 = vsyncpa [#allocation4], 1 }

</bundles_post_ra>
